<compile_context>
chip_gen: v6e
topology: v6e:2x2x1
jax: 0.10.0
libtpu: 0.0.40
codegen_flags: <defaults>
</compile_context>

<pallas_src>
import functools

import jax
import jax.numpy as jnp
from jax.experimental import pallas as pl
from jax.experimental.pallas import tpu as pltpu


def _sublayer_connection_kernel(x_ref, a2_ref, b2_ref, w_ref, bias_ref, *rest,
                                eps, dropout_rate, training):
    use_dropout = training and dropout_rate > 0.0
    if use_dropout:
        bits_ref, o_ref = rest
    else:
        (o_ref,) = rest

    x = x_ref[...].astype(jnp.float32)                      # (TM, D)
    d = x.shape[-1]

    # --- LayerNorm (PyTorch: unbiased std, eps added to std) ---
    mean = jnp.mean(x, axis=-1, keepdims=True)
    xc = x - mean
    denom = max(d - 1, 1)                                   # Bessel correction
    var = jnp.sum(xc * xc, axis=-1, keepdims=True) * (1.0 / denom)
    std = jnp.sqrt(var)
    # Per-row reciprocal on a (TM, 1) value, then a broadcast multiply; avoids
    # a full (TM, D) divide on the VALU.
    inv = 1.0 / (std + eps)
    y = a2_ref[...] * (xc * inv) + b2_ref[...]              # (TM, D) f32

    # --- sublayer: dense projection on the MXU (bf16 in, f32 accumulate) ---
    s = jnp.dot(y.astype(jnp.bfloat16), w_ref[...],
                preferred_element_type=jnp.float32) + bias_ref[...]

    # --- inverted dropout, integer-threshold keep decision ---
    if use_dropout:
        threshold = jnp.uint32(min(int(dropout_rate * (1 << 32)), (1 << 32) - 1))
        scale = jnp.float32(1.0 / (1.0 - dropout_rate))
        s = jnp.where(bits_ref[...] >= threshold, s * scale, jnp.float32(0.0))

    # --- residual ---
    o_ref[...] = (x + s).astype(o_ref.dtype)


def sublayer_connection(x, a2, b2, w, bias, *, eps=1e-6, dropout_rate=0.1,
                        training=False, rng_key=None, tile_rows=256):
    """x: (B, S, D).  Returns x + dropout(dense(layernorm(x)))."""
    B, S, D = x.shape
    rows = B * S
    out_dtype = x.dtype

    # Row tile: big enough to feed the MXU / amortize per-grid-step overhead,
    # capped at the problem size, multiple of 8 (f32 sublane tiling).
    tm = min(tile_rows, rows)
    tm = max(8, (tm // 8) * 8)
    rows_pad = pl.cdiv(rows, tm) * tm

    x2 = x.reshape(rows, D)
    if rows_pad != rows:
        x2 = jnp.pad(x2, ((0, rows_pad - rows), (0, 0)))

    a2_2 = a2.reshape(1, D).astype(jnp.float32)
    b2_2 = b2.reshape(1, D).astype(jnp.float32)
    bias_2 = bias.reshape(1, D).astype(jnp.float32)
    w_bf16 = w.astype(jnp.bfloat16)     # bf16 weight block (MXU-native, half VMEM)

    use_dropout = training and dropout_rate > 0.0

    in_specs = [
        pl.BlockSpec((tm, D), lambda i: (i, 0)),     # x tile
        pl.BlockSpec((1, D), lambda i: (0, 0)),      # a_2
        pl.BlockSpec((1, D), lambda i: (0, 0)),      # b_2
        pl.BlockSpec((D, D), lambda i: (0, 0)),      # W (bf16)
        pl.BlockSpec((1, D), lambda i: (0, 0)),      # bias
    ]
    operands = [x2, a2_2, b2_2, w_bf16, bias_2]

    if use_dropout:
        if rng_key is None:
            rng_key = jax.random.PRNGKey(0)
        # Mask bits drawn once host-side (portable: works on TPU and in
        # interpret mode); integer-threshold keep decision happens in-kernel.
        bits = jax.random.bits(rng_key, (rows_pad, D), dtype=jnp.uint32)
        in_specs.append(pl.BlockSpec((tm, D), lambda i: (i, 0)))
        operands.append(bits)

    flops = 2 * rows_pad * D * D
    bytes_accessed = (2 * rows_pad * D * jnp.dtype(out_dtype).itemsize   # x in + out
                      + D * D * 2                                        # bf16 weights
                      + (rows_pad * D * 4 if use_dropout else 0)         # dropout bits
                      + 3 * D * 4)                                       # a_2, b_2, bias

    kernel = functools.partial(_sublayer_connection_kernel, eps=eps,
                               dropout_rate=dropout_rate, training=training)

    out = pl.pallas_call(
        kernel,
        out_shape=jax.ShapeDtypeStruct((rows_pad, D), out_dtype),
        grid=(rows_pad // tm,),
        in_specs=in_specs,
        out_specs=pl.BlockSpec((tm, D), lambda i: (i, 0)),
        compiler_params=pltpu.CompilerParams(
            dimension_semantics=("parallel",),            # independent row tiles
            vmem_limit_bytes=64 * 1024 * 1024),
        cost_estimate=pl.CostEstimate(flops=flops, transcendentals=rows_pad,
                                      bytes_accessed=bytes_accessed),
    )(*operands)

    if rows_pad != rows:
        out = out[:rows]
    return out.reshape(B, S, D)


if __name__ == "__main__":
    B, S, D = 2, 8, 128   # size = D = 128 (lane-dense feature axis)
    eps = 1e-6
    dropout_rate = 0.1

    key = jax.random.PRNGKey(0)
    kx, kw, kd = jax.random.split(key, 3)
    x = jax.random.normal(kx, (B, S, D), dtype=jnp.float32)

    # Parameters, deterministic init (matching the module's __init__ shapes):
    a2 = jnp.ones((D,), dtype=jnp.float32)    # LayerNorm.a_2
    b2 = jnp.zeros((D,), dtype=jnp.float32)   # LayerNorm.b_2
    W = 0.02 * jax.random.normal(kw, (D, D), dtype=jnp.float32)  # sublayer weight
    bias = jnp.zeros((D,), dtype=jnp.float32)                    # sublayer bias

    # Eval-mode run (dropout = identity) -> check against a pure-JAX reference
    # that mirrors the kernel's bf16 matmul with f32 accumulation.
    out_eval = sublayer_connection(x, a2, b2, W, bias, eps=eps,
                                   dropout_rate=dropout_rate, training=False)
    out_eval = jax.block_until_ready(out_eval)

    mean = x.mean(-1, keepdims=True)
    std = jnp.std(x, axis=-1, keepdims=True, ddof=1)
    y_ref = a2 * (x - mean) / (std + eps) + b2
    s_ref = jnp.dot(y_ref.reshape(-1, D).astype(jnp.bfloat16),
                    W.astype(jnp.bfloat16),
                    preferred_element_type=jnp.float32).reshape(B, S, D) + bias
    ref = x + s_ref
    assert jnp.allclose(out_eval, ref, atol=1e-2, rtol=1e-2), "mismatch vs reference"

    # Training-mode run (stochastic inverted dropout applied inside the kernel).
    out_train = sublayer_connection(x, a2, b2, W, bias, eps=eps,
                                    dropout_rate=dropout_rate, training=True,
                                    rng_key=kd)
    out_train = jax.block_until_ready(out_train)
    assert bool(jnp.all(jnp.isfinite(out_train)))

    print("KERNEL_OK")
</pallas_src>

<mosaic_0001>
module attributes {stable_mosaic.version = 11 : i64} {
  func.func @_sublayer_connection_kernel(%arg0: i32, %arg1: memref<16x128xf32, #tpu.memory_space<vmem>>, %arg2: memref<1x128xf32, #tpu.memory_space<vmem>>, %arg3: memref<1x128xf32, #tpu.memory_space<vmem>>, %arg4: memref<128x128xbf16, #tpu.memory_space<vmem>>, %arg5: memref<1x128xf32, #tpu.memory_space<vmem>>, %arg6: memref<16x128xf32, #tpu.memory_space<vmem>>) attributes {dimension_semantics = [#tpu.dimension_semantics<parallel>], iteration_bounds = array<i64: 1>, scalar_prefetch = 0 : i64, scratch_operands = 0 : i64, tpu.core_type = #tpu.core_type<tc>, window_params = [{transform_indices = @transform_0, window_bounds = array<i64: 16, 128>}, {pipeline_mode = #tpu.pipeline_mode<synchronous>, transform_indices = @transform_1, window_bounds = array<i64: 1, 128>}, {pipeline_mode = #tpu.pipeline_mode<synchronous>, transform_indices = @transform_2, window_bounds = array<i64: 1, 128>}, {pipeline_mode = #tpu.pipeline_mode<synchronous>, transform_indices = @transform_3, window_bounds = array<i64: 128, 128>}, {pipeline_mode = #tpu.pipeline_mode<synchronous>, transform_indices = @transform_4, window_bounds = array<i64: 1, 128>}, {transform_indices = @transform_5, window_bounds = array<i64: 16, 128>}]} {
    %c0 = arith.constant 0 : index
    %c0_0 = arith.constant 0 : index
    %0 = vector.load %arg1[%c0, %c0_0] : memref<16x128xf32, #tpu.memory_space<vmem>>, vector<16x128xf32>
    %cst = arith.constant dense<0.000000e+00> : vector<16xf32>
    %1 = vector.multi_reduction <add>, %0, %cst [1] : vector<16x128xf32> to vector<16xf32>
    %2 = vector.shape_cast %1 : vector<16xf32> to vector<16x1xf32>
    %cst_1 = arith.constant 1.280000e+02 : f32
    %3 = vector.broadcast %cst_1 : f32 to vector<16x1xf32>
    %4 = arith.divf %2, %3 : vector<16x1xf32>
    %5 = vector.broadcast %4 : vector<16x1xf32> to vector<16x128xf32>
    %6 = arith.subf %0, %5 : vector<16x128xf32>
    %7 = arith.mulf %6, %6 : vector<16x128xf32>
    %cst_2 = arith.constant dense<0.000000e+00> : vector<16xf32>
    %8 = vector.multi_reduction <add>, %7, %cst_2 [1] : vector<16x128xf32> to vector<16xf32>
    %9 = vector.shape_cast %8 : vector<16xf32> to vector<16x1xf32>
    %cst_3 = arith.constant 0.00787401571 : f32
    %10 = vector.broadcast %cst_3 : f32 to vector<16x1xf32>
    %11 = arith.mulf %9, %10 : vector<16x1xf32>
    %12 = math.sqrt %11 : vector<16x1xf32>
    %cst_4 = arith.constant 9.99999997E-7 : f32
    %13 = vector.broadcast %cst_4 : f32 to vector<16x1xf32>
    %14 = arith.addf %12, %13 : vector<16x1xf32>
    %cst_5 = arith.constant 1.000000e+00 : f32
    %15 = vector.broadcast %cst_5 : f32 to vector<16x1xf32>
    %16 = arith.divf %15, %14 : vector<16x1xf32>
    %c0_6 = arith.constant 0 : index
    %c0_7 = arith.constant 0 : index
    %17 = vector.load %arg2[%c0_6, %c0_7] : memref<1x128xf32, #tpu.memory_space<vmem>>, vector<1x128xf32>
    %18 = vector.broadcast %16 : vector<16x1xf32> to vector<16x128xf32>
    %19 = arith.mulf %6, %18 : vector<16x128xf32>
    %20 = vector.broadcast %17 : vector<1x128xf32> to vector<16x128xf32>
    %21 = arith.mulf %20, %19 : vector<16x128xf32>
    %c0_8 = arith.constant 0 : index
    %c0_9 = arith.constant 0 : index
    %22 = vector.load %arg3[%c0_8, %c0_9] : memref<1x128xf32, #tpu.memory_space<vmem>>, vector<1x128xf32>
    %23 = vector.broadcast %22 : vector<1x128xf32> to vector<16x128xf32>
    %24 = arith.addf %21, %23 : vector<16x128xf32>
    %25 = arith.truncf %24 : vector<16x128xf32> to vector<16x128xbf16>
    %c0_10 = arith.constant 0 : index
    %c0_11 = arith.constant 0 : index
    %26 = vector.load %arg4[%c0_10, %c0_11] : memref<128x128xbf16, #tpu.memory_space<vmem>>, vector<128x128xbf16>
    %cst_12 = arith.constant dense<0.000000e+00> : vector<16x128xf32>
    %27 = tpu.matmul %25, %26, %cst_12 {dimension_numbers = #tpu.dot_dimension_numbers<[1], [0], [0], [1], [0, 0, 1, 1], [], []>} : vector<16x128xbf16>, vector<128x128xbf16>, vector<16x128xf32> -> vector<16x128xf32>
    %c0_13 = arith.constant 0 : index
    %c0_14 = arith.constant 0 : index
    %28 = vector.load %arg5[%c0_13, %c0_14] : memref<1x128xf32, #tpu.memory_space<vmem>>, vector<1x128xf32>
    %29 = vector.broadcast %28 : vector<1x128xf32> to vector<16x128xf32>
    %30 = arith.addf %27, %29 : vector<16x128xf32>
    %31 = arith.addf %0, %30 : vector<16x128xf32>
    %c0_15 = arith.constant 0 : index
    %c0_16 = arith.constant 0 : index
    %32 = vector.load %arg6[%c0_15, %c0_16] : memref<16x128xf32, #tpu.memory_space<vmem>>, vector<16x128xf32>
    tpu.vector_store %arg6[%c0_15, %c0_16], %31 {strides = array<i32>} : memref<16x128xf32, #tpu.memory_space<vmem>>, vector<16x128xf32>,
    return
  }
  func.func @transform_0(%arg0: i32) -> (i32, i32) {
    %c0_i32 = arith.constant 0 : i32
    %c0_i32_0 = arith.constant 0 : i32
    return %arg0, %c0_i32 : i32, i32
  }
  func.func @transform_1(%arg0: i32) -> (i32, i32) {
    %c0_i32 = arith.constant 0 : i32
    %c0_i32_0 = arith.constant 0 : i32
    %c0_i32_1 = arith.constant 0 : i32
    return %c0_i32, %c0_i32_0 : i32, i32
  }
  func.func @transform_2(%arg0: i32) -> (i32, i32) {
    %c0_i32 = arith.constant 0 : i32
    %c0_i32_0 = arith.constant 0 : i32
    %c0_i32_1 = arith.constant 0 : i32
    return %c0_i32, %c0_i32_0 : i32, i32
  }
  func.func @transform_3(%arg0: i32) -> (i32, i32) {
    %c0_i32 = arith.constant 0 : i32
    %c0_i32_0 = arith.constant 0 : i32
    %c0_i32_1 = arith.constant 0 : i32
    return %c0_i32, %c0_i32_0 : i32, i32
  }
  func.func @transform_4(%arg0: i32) -> (i32, i32) {
    %c0_i32 = arith.constant 0 : i32
    %c0_i32_0 = arith.constant 0 : i32
    %c0_i32_1 = arith.constant 0 : i32
    return %c0_i32, %c0_i32_0 : i32, i32
  }
  func.func @transform_5(%arg0: i32) -> (i32, i32) {
    %c0_i32 = arith.constant 0 : i32
    %c0_i32_0 = arith.constant 0 : i32
    return %arg0, %c0_i32 : i32, i32
  }
}

</mosaic_0001>

<bundles_post_ra>
// kernel: tpu_custom_call.1
= control target key start
LH: loop header
LB: loop body
LE: loop exit
PB: predicated region body
PF: predicated region fallthrough
CT: control target
= control target key end

     0   :  { %10 = vsyncpa [#allocation3], 0  ;;  %s448_s0 = inlined_call_operand.hbm [shape: f32[16,128], index: 0, kind: input, shape index: {}]   ;;  %s449_s1 = inlined_call_operand.vmem [shape: f32[1,128], index: 1, kind: input, shape index: {}]   ;;  %s450_s2 = inlined_call_operand.vmem [shape: f32[1,128], index: 2, kind: input, shape index: {}]   ;;  %s451_s3 = inlined_call_operand.hbm [shape: bf16[128,128], index: 3, kind: input, shape index: {}]   ;;  %s452_s4 = inlined_call_operand.vmem [shape: f32[1,128], index: 4, kind: input, shape index: {}]   ;;  %s453_s5 = inlined_call_operand.hbm [shape: f32[16,128], index: 5, kind: output, shape index: {}]  }
   0x1   :  { %11 = vsyncpa [#allocation6], 0 }
   0x2   :  { %12 = vsyncpa [#allocation4], 0  ;;  %s375_s18 = smov [#allocation2]  }
   0x3   :  { %s18_s19 = sshll.u32 %s375_s18, 4  ;;  %s19_s19 = int_to_ptr.vmem [resolvable:$true] %s18_s19 }
   0x4   :  { %s317_s20 = scalar_lea.vmem %s19_s19, 256  ;;  %p322_p1 = scmp.lt.s32.totalorder %s19_s19, %s19_s19 }
   0x5   :  { %p318_p0 = scmp.ne.s32.totalorder %s19_s19, %s317_s20  ;;  %p323_p2 = scmp.lt.s32.totalorder %s317_s20, %s317_s20 }
   0x7   :  { %p324_p3 = por %p323_p2, %p322_p1 }
   0x9   :  { %p325_p4 = pnand %p324_p3, %p318_p0 }
   0xb   :  { %328 = shalt.err (!%p325_p4)
}
   0xc   :  { %s376_s21 = smov 128   ;;  %s377_s22 = smov 8  }
   0xd   :  { %24 = dma.hbm_to_vmem [thread:$0]  %s448_s0, 256, %s19_s19, [#allocation3], %s376_s21, %s376_s21, %s377_s22  }
   0xe   :  { %s378_s25 = smov [#allocation5]  }
   0xf   :  { %s34_s26 = sshll.u32 %s378_s25, 4  ;;  %s35_s26 = int_to_ptr.vmem [resolvable:$true] %s34_s26 }
  0x10   :  { %s337_s27 = scalar_lea.vmem %s35_s26, 1024  ;;  %p342_p6 = scmp.lt.s32.totalorder %s35_s26, %s35_s26 }
  0x11   :  { %p338_p5 = scmp.ne.s32.totalorder %s35_s26, %s337_s27  ;;  %p343_p7 = scmp.lt.s32.totalorder %s337_s27, %s337_s27 }
  0x13   :  { %p344_p8 = por %p343_p7, %p342_p6 }
  0x15   :  { %p345_p9 = pnand %p344_p8, %p338_p5 }
  0x17   :  { %348 = shalt.err (!%p345_p9)
}
  0x18   :  { %s379_s28 = smov 64   ;;  %s380_s29 = smov 4  }
  0x19   :  { %40 = dma.hbm_to_vmem [thread:$0]  %s451_s3, 1024, %s35_s26, [#allocation6], %s379_s28, %s379_s28, %s380_s29  }
  0x1a   :  { %369 = dma.done.wait [#allocation3], 256  }
  0x1b   :  { %370 = vsyncadd [#allocation3], 4294967040 }
  0x1c   :  { %371 = dma.done.wait [#allocation6], 1024  }
  0x1d   :  { %372 = vsyncadd [#allocation6], 4294966272  ;;  %v423_v0 = vld [vmem:[#allocation2] sm:$0xff]  ;;  %v425_v1 = vld [vmem:[#allocation2 + $0x8] sm:$0xff]  ;;  %v381_v11 = vmov 0.0   ;;  %vm382_vm0 = vmmov 0  }
  0x1e   :  { %52 = vadd.xlane.f32.xlu0 %v423_v0  ;;  %v293_v10 = vld [vmem:[#allocation5 + $0x38] sm:$0xff]   ;;  %264 = vmatprep.subr.bf16.mxu0 %v381_v11  ;;  %v294_v12 = vld [vmem:[#allocation5 + $0x30] sm:$0xff]   ;;  %v295_v13 = vld [vmem:[#allocation5 + $0x28] sm:$0xff]  }
  0x1f   :  { %265 = vmatpush3.bf16.msra.mxu0 %v293_v10  ;;  %v296_v14 = vld [vmem:[#allocation5 + $0x20] sm:$0xff]   ;;  %280 = vmatprep.mubr.msk.bf16.mxu0 %vm382_vm0, %v381_v11  ;;  %v297_v15 = vld [vmem:[#allocation5 + $0x18] sm:$0xff]   ;;  %v298_v16 = vld [vmem:[#allocation5 + $0x10] sm:$0xff]  }
  0x20   :  { %266 = vmatprep.subr.bf16.mxu0 %v381_v11  ;;  %v299_v17 = vld [vmem:[#allocation5 + $0x8] sm:$0xff]   ;;  %v300_v18 = vld [vmem:[#allocation5] sm:$0xff]   ;;  %v244_v37 = vld [vmem:[%s449_s1] ss:$0 sm:$0xff]  ;;  %s383_s1 = smov [#allocation7]  }
  0x21   :  { %v245_v41 = vld [vmem:[%s450_s2] ss:$0 sm:$0xff]  ;;  %s231_s11 = sshll.u32 %s383_s1, 4  ;;  %s232_s11 = int_to_ptr.vmem [resolvable:$true] %s231_s11 }
  0x22   :  { %54 = vadd.xlane.f32.xlu0 %v425_v1  ;;  %v246_v46 = vld [vmem:[%s452_s4] ss:$0 sm:$0xff]  ;;  %s349_s2 = scalar_lea.vmem %s232_s11, 256  ;;  %p354_p11 = scmp.lt.s32.totalorder %s232_s11, %s232_s11 }
  0x23   :  { %267 = vmatpush3.bf16.msra.mxu0 %v294_v12  ;;  %p350_p10 = scmp.ne.s32.totalorder %s232_s11, %s349_s2  ;;  %p355_p12 = scmp.lt.s32.totalorder %s349_s2, %s349_s2 }
  0x24   :  { %268 = vmatprep.subr.bf16.mxu0 %v381_v11 }
  0x25   :  { %p356_p13 = por %p355_p12, %p354_p11 }
  0x27   :  { %269 = vmatpush3.bf16.msra.mxu0 %v295_v13  ;;  %p357_p0 = pnand %p356_p13, %p350_p10 }
  0x28   :  { %270 = vmatprep.subr.bf16.mxu0 %v381_v11 }
  0x2b   :  { %271 = vmatpush3.bf16.msra.mxu0 %v296_v14 }
  0x2c   :  { %272 = vmatprep.subr.bf16.mxu0 %v381_v11 }
  0x2f   :  { %273 = vmatpush3.bf16.msra.mxu0 %v297_v15 }
  0x30   :  { %274 = vmatprep.subr.bf16.mxu0 %v381_v11 }
  0x33   :  { %275 = vmatpush3.bf16.msra.mxu0 %v298_v16 }
  0x34   :  { %276 = vmatprep.subr.bf16.mxu0 %v381_v11 }
  0x37   :  { %277 = vmatpush3.bf16.msra.mxu0 %v299_v17 }
  0x38   :  { %278 = vmatprep.subr.bf16.mxu0 %v381_v11 }
  0x3b   :  { %279 = vmatpush3.bf16.msra.mxu0 %v300_v18 }
  0xa7   :  { %v53_v2 = vpop.xlane.xlu0 %52 }
  0xa8   :  { %v57_v3 = vmul.f32 0.0078125, %v53_v2 }
  0xaa   :  { %v59_v4 = vsub.f32 %v423_v0, %v57_v3 }
  0xab   :  { %v55_v5 = vpop.xlane.xlu0 %54 }
  0xac   :  { %v58_v6 = vmul.f32 0.0078125, %v55_v5  ;;  %v61_v7 = vmul.f32 %v59_v4, %v59_v4 }
  0xae   :  { %v60_v8 = vsub.f32 %v425_v1, %v58_v6  ;;  %63 = vadd.xlane.f32.xlu1 %v61_v7 }
  0xb0   :  { %v62_v9 = vmul.f32 %v60_v8, %v60_v8 }
  0xb2   :  { %65 = vadd.xlane.f32.xlu1 %v62_v9 }
 0x137   :  { %v64_v19 = vpop.xlane.xlu1 %63 }
 0x138   :  { %v67_v20 = vmul.f32 0.007874016, %v64_v19 }
 0x13a   :  { %301 = vrsqrt.f32 %v67_v20  ;;  %vm71_vm1 = vcmp.eq.f32.partialorder %v67_v20, inf  ;;  %v74_v25 = vand.u32 2147483648, %v67_v20  ;;  %vm73_vm2 = vcmp.eq.f32.partialorder %v67_v20, 0.0 }
 0x13b   :  { %v66_v21 = vpop.xlane.xlu1 %65 }
 0x13c   :  { %v68_v22 = vmul.f32 0.007874016, %v66_v21 }
 0x13e   :  { %303 = vrsqrt.f32 %v68_v22  ;;  %vm78_vm3 = vcmp.eq.f32.partialorder %v68_v22, inf  ;;  %v81_v31 = vand.u32 2147483648, %v68_v22  ;;  %vm80_vm4 = vcmp.eq.f32.partialorder %v68_v22, 0.0 }
 0x147   :  { %v302_v23 = vpop.eup %301 }
 0x148   :  { %v70_v24 = vmul.f32 %v302_v23, %v67_v20 }
 0x14a   :  { %v72_v26 = vsel %vm71_vm1, %v67_v20, %v70_v24 }
 0x14b   :  { %v304_v27 = vpop.eup %303  ;;  %v75_v28 = vsel %vm73_vm2, %v74_v25, %v72_v26 }
 0x14c   :  { %v83_v29 = vadd.f32 1e-06, %v75_v28  ;;  %v77_v30 = vmul.f32 %v304_v27, %v68_v22 }
 0x14e   :  { %305 = vrcp.f32 %v83_v29  ;;  %v79_v32 = vsel %vm78_vm3, %v68_v22, %v77_v30 }
 0x14f   :  { %v82_v33 = vsel %vm80_vm4, %v81_v31, %v79_v32 }
 0x150   :  { %v84_v34 = vadd.f32 1e-06, %v82_v33 }
 0x152   :  { %307 = vrcp.f32 %v84_v34 }
 0x15b   :  { %v306_v35 = vpop.eup %305 }
 0x15c   :  { %v90_v36 = vmul.f32 %v306_v35, %v59_v4 }
 0x15e   :  { %v98_v40 = vmul.f32 %v244_v37, %v90_v36 }
 0x15f   :  { %v308_v38 = vpop.eup %307 }
 0x160   :  { %v91_v39 = vmul.f32 %v308_v38, %v60_v8  ;;  %v107_v43 = vadd.f32 %v245_v41, %v98_v40 }
 0x162   :  { %v99_v42 = vmul.f32 %v244_v37, %v91_v39 }
 0x164   :  { %v108_v44 = vadd.f32 %v245_v41, %v99_v42 }
 0x166   :  { %v109_v45 = vpack.c.bf16 %v108_v44, %v107_v43 }
 0x168   :  { %281 = vmatmul.mubr.bf16.vlgmr.msra.gmra.mxu0 %v109_v45 }
 0x228   :  { %v215_v47 = vpop.f32.mrf.mxu0 }
 0x229   :  { %v216_v48 = vadd.f32 %v246_v46, %v215_v47 }
 0x22a   :  { %v282_v49 = vpop.f32.mrf.mxu0 }
 0x22b   :  { %v222_v50 = vadd.f32 %v216_v48, %v423_v0 }
 0x22c   :  { %v218_v51 = vpop.f32.mrf.mxu0 }
 0x22d   :  { %224 = vst [vmem:[#allocation7] sm:$0xff] %v222_v50  ;;  %v219_v52 = vadd.f32 %v246_v46, %v218_v51 }
 0x22e   :  { %v283_v53 = vpop.f32.mrf.mxu0 }
 0x22f   :  { %v223_v54 = vadd.f32 %v219_v52, %v425_v1 }
 0x231   :  { %225 = vst [vmem:[#allocation7 + $0x8] sm:$0xff] %v223_v54 }
 0x232   :  { %360 = shalt.err (!%p357_p0)
}
 0x233   :  { %237 = dma.vmem_to_hbm [thread:$0]  %s232_s11, 256, %s453_s5, [#allocation4], %s376_s21, %s376_s21, %s377_s22  }
 0x234   :  { %373 = dma.done.wait [#allocation4], 256  }
 0x235   :  { %374 = vsyncadd [#allocation4], 4294967040 }
 0x236   :  { %241 = vsyncpa [#allocation3], 1 }
 0x237   :  { %242 = vsyncpa [#allocation6], 1 }
 0x238   :  { %243 = vsyncpa [#allocation4], 1 }

</bundles_post_ra>
